<compile_context>
chip_gen: v7x
topology: tpu7x:2x2x1
jax: 0.10.0
libtpu: 0.0.40
codegen_flags: <defaults>
</compile_context>

<pallas_src>
import jax
import jax.numpy as jnp
from jax.experimental import pallas as pl
from jax.experimental.pallas import tpu as pltpu


def cancelout_kernel(x_ref, w_ref, o_ref):
    # x_ref: (tile_b, tile_f) activation block; w_ref: (1, tile_f) f32 weight
    # tile (broadcast over the batch rows). Relu + multiply in f32, cast only
    # the product to the output dtype.
    w = jnp.maximum(w_ref[...], 0.0)
    o_ref[...] = (x_ref[...] * w).astype(o_ref.dtype)


def _round_up(x, m):
    return ((x + m - 1) // m) * m


def _budgets():
    """Per-generation (max_block_bytes, vmem_limit_bytes)."""
    try:
        vmem_cap = pltpu.get_tpu_info().vmem_capacity_bytes
    except Exception:
        vmem_cap = 64 * 1024 * 1024  # conservative fallback (v7x per-TC)
    if vmem_cap >= 100 * 1024 * 1024:
        # v5e / v6e: 128 MiB physical VMEM.
        return 8 * 1024 * 1024, 64 * 1024 * 1024
    # v7x: 64 MiB per TensorCore.
    return 6 * 1024 * 1024, 48 * 1024 * 1024


def _choose_tiles(B, F, itemsize, max_block_bytes):
    """Pick (tile_b, tile_f): lane/sublane aligned, within the block budget,
    full feature rows preferred, >= 2 parallel grid steps when possible."""
    F_lanes = _round_up(F, 128)          # lane width of one full feature row
    row_bytes = F_lanes * itemsize

    if 8 * row_bytes <= max_block_bytes:
        # Full-row blocks: contiguous HBM slabs; weight tile stays resident.
        tile_f = F_lanes
        max_rows = max(8, (max_block_bytes // row_bytes) // 8 * 8)
        tile_b = min(max_rows, _round_up(B, 8))
        if pl.cdiv(B, tile_b) == 1:
            if B >= 16:
                # Split the batch into >= 2 blocks (pipelining + v7x megacore).
                tile_b = _round_up(pl.cdiv(B, 2), 8)
            elif F_lanes >= 256:
                # Tiny batch: split features across the two v7x TensorCores.
                tile_f = _round_up(pl.cdiv(F_lanes, 2), 128)
    else:
        # A single 8-row slab already exceeds the budget: split features,
        # rounding down to a multiple of 128 lanes (never below 128).
        tile_b = 8
        tile_f = max(128, (max_block_bytes // (8 * itemsize)) // 128 * 128)
    return tile_b, tile_f


def cancelout(x, weight):
    """x: (B, F), weight: (F,)  ->  (B, F) = x * relu(weight), math in f32."""
    B, F = x.shape
    out_dtype = x.dtype
    itemsize = jnp.dtype(out_dtype).itemsize

    max_block_bytes, vmem_limit = _budgets()
    tile_b, tile_f = _choose_tiles(B, F, itemsize, max_block_bytes)

    # Grid: features outer, batch inner -> the (0, j) weight block index is
    # constant across the inner batch loop, so the weight is not re-DMA'd.
    grid = (pl.cdiv(F, tile_f), pl.cdiv(B, tile_b))

    # Matches PyTorch's `self.weight.float()`.
    w2d = weight.reshape(1, F).astype(jnp.float32)

    return pl.pallas_call(
        cancelout_kernel,
        out_shape=jax.ShapeDtypeStruct((B, F), out_dtype),
        grid=grid,
        in_specs=[
            pl.BlockSpec((tile_b, tile_f), lambda j, i: (i, j)),
            pl.BlockSpec((1, tile_f), lambda j, i: (0, j)),
        ],
        out_specs=pl.BlockSpec((tile_b, tile_f), lambda j, i: (i, j)),
        compiler_params=pltpu.CompilerParams(
            dimension_semantics=("parallel", "parallel"),
            vmem_limit_bytes=vmem_limit,
        ),
    )(x, w2d)


# TODO(synk): CancelOut.regularization() (L1 norm of relu(weight) / len) is a
# tiny scalar quantity, not part of forward(); left to plain JAX.


if __name__ == "__main__":
    key = jax.random.PRNGKey(0)

    # --- case 1: the module's natural small shape -------------------------
    batch, input_size = 8, 128
    weight = jnp.zeros((input_size,), dtype=jnp.float32) + 4.0  # torch.zeros+4
    x = jax.random.normal(key, (batch, input_size), dtype=jnp.float32)

    out = jax.block_until_ready(cancelout(x, weight))
    ref = x * jnp.maximum(weight, 0.0)
    assert out.shape == (batch, input_size)
    assert jnp.allclose(out, ref, atol=1e-6, rtol=1e-6)

    # --- case 2: ragged batch + non-128-multiple features (masked edges) --
    k1, k2 = jax.random.split(key)
    b2, f2 = 20, 200
    w2 = jax.random.normal(k1, (f2,), dtype=jnp.float32)  # mixed-sign weights
    x2 = jax.random.normal(k2, (b2, f2), dtype=jnp.float32)

    out2 = jax.block_until_ready(cancelout(x2, w2))
    ref2 = x2 * jnp.maximum(w2, 0.0)
    assert out2.shape == (b2, f2)
    assert jnp.allclose(out2, ref2, atol=1e-6, rtol=1e-6)

    # --- case 3: tiny batch, wide features (feature-split path) -----------
    k3, k4 = jax.random.split(k1)
    b3, f3 = 2, 512
    w3 = jax.random.normal(k3, (f3,), dtype=jnp.float32)
    x3 = jax.random.normal(k4, (b3, f3), dtype=jnp.float32)

    out3 = jax.block_until_ready(cancelout(x3, w3))
    ref3 = x3 * jnp.maximum(w3, 0.0)
    assert out3.shape == (b3, f3)
    assert jnp.allclose(out3, ref3, atol=1e-6, rtol=1e-6)

    # --- case 4: bf16 activations, f32 weight math preserved --------------
    k5, k6 = jax.random.split(k2)
    b4, f4 = 64, 384
    w4 = jax.random.normal(k5, (f4,), dtype=jnp.float32)
    x4 = jax.random.normal(k6, (b4, f4), dtype=jnp.bfloat16)

    out4 = jax.block_until_ready(cancelout(x4, w4))
    ref4 = (x4.astype(jnp.float32) * jnp.maximum(w4, 0.0)).astype(jnp.bfloat16)
    assert out4.shape == (b4, f4)
    assert jnp.allclose(out4.astype(jnp.float32), ref4.astype(jnp.float32),
                        atol=1e-2, rtol=1e-2)

    print("KERNEL_OK")
</pallas_src>

<mosaic_0001>
module attributes {stable_mosaic.version = 11 : i64} {
  func.func @cancelout_kernel(%arg0: i32, %arg1: i32, %arg2: memref<8x128xf32, #tpu.memory_space<vmem>>, %arg3: memref<1x128xf32, #tpu.memory_space<vmem>>, %arg4: memref<8x128xf32, #tpu.memory_space<vmem>>) attributes {dimension_semantics = [#tpu.dimension_semantics<parallel>, #tpu.dimension_semantics<parallel>], iteration_bounds = array<i64: 1, 1>, scalar_prefetch = 0 : i64, scratch_operands = 0 : i64, tpu.core_type = #tpu.core_type<tc>, window_params = [{transform_indices = @transform_0, window_bounds = array<i64: 8, 128>}, {transform_indices = @transform_1, window_bounds = array<i64: 1, 128>}, {transform_indices = @transform_2, window_bounds = array<i64: 8, 128>}]} {
    %c0 = arith.constant 0 : index
    %c0_0 = arith.constant 0 : index
    %0 = vector.load %arg3[%c0, %c0_0] : memref<1x128xf32, #tpu.memory_space<vmem>>, vector<1x128xf32>
    %cst = arith.constant 0.000000e+00 : f32
    %1 = vector.broadcast %cst : f32 to vector<1x128xf32>
    %2 = arith.maximumf %0, %1 : vector<1x128xf32>
    %c0_1 = arith.constant 0 : index
    %c0_2 = arith.constant 0 : index
    %3 = vector.load %arg2[%c0_1, %c0_2] : memref<8x128xf32, #tpu.memory_space<vmem>>, vector<8x128xf32>
    %4 = vector.broadcast %2 : vector<1x128xf32> to vector<8x128xf32>
    %5 = arith.mulf %3, %4 : vector<8x128xf32>
    %c0_3 = arith.constant 0 : index
    %c0_4 = arith.constant 0 : index
    %6 = vector.load %arg4[%c0_3, %c0_4] : memref<8x128xf32, #tpu.memory_space<vmem>>, vector<8x128xf32>
    tpu.vector_store %arg4[%c0_3, %c0_4], %5 {strides = array<i32>} : memref<8x128xf32, #tpu.memory_space<vmem>>, vector<8x128xf32>,
    return
  }
  func.func @transform_0(%arg0: i32, %arg1: i32) -> (i32, i32) {
    %c0_i32 = arith.constant 0 : i32
    return %arg1, %arg0 : i32, i32
  }
  func.func @transform_1(%arg0: i32, %arg1: i32) -> (i32, i32) {
    %c0_i32 = arith.constant 0 : i32
    %c0_i32_0 = arith.constant 0 : i32
    return %c0_i32, %arg0 : i32, i32
  }
  func.func @transform_2(%arg0: i32, %arg1: i32) -> (i32, i32) {
    %c0_i32 = arith.constant 0 : i32
    return %arg1, %arg0 : i32, i32
  }
}

</mosaic_0001>

<bundles_post_ra>
// kernel: tpu_custom_call.1
= control target key start
LH: loop header
LB: loop body
LE: loop exit
PB: predicated region body
PF: predicated region fallthrough
CT: control target
= control target key end

     0   :  { %7 = vsyncpa [#allocation3], 0  ;;  %s144_s0 = inlined_call_operand.hbm [shape: f32[8,128], index: 0, kind: input, shape index: {}]   ;;  %s145_s1 = inlined_call_operand.vmem [shape: f32[1,128], index: 1, kind: input, shape index: {}]   ;;  %s146_s2 = inlined_call_operand.hbm [shape: f32[8,128], index: 2, kind: output, shape index: {}]  }
   0x1   :  { %8 = vsyncpa [#allocation4], 0  ;;  %s100_s9 = smov [#allocation2]   ;;  %s52_s13 = scalar_lea.hbm %s144_s0, 128 }
   0x2   :  { %s15_s10 = sshll.u32 %s100_s9, 4  ;;  %p53_p0 = scmp.ne.s32.totalorder %s144_s0, %s52_s13  ;;  %s16_s10 = int_to_ptr.vmem [resolvable:$true] %s15_s10 }
   0x3   :  { %p56_p1 = scmp.lt.u32.totalorder %s52_s13, %s144_s0 }
   0x5   :  { %p58_p2 = pnand %p56_p1, %p53_p0 }
   0x7   :  { %61 = shalt.err (!%p58_p2)
}
   0x8   :  { %s62_s18 = scalar_lea.vmem %s16_s10, 128  ;;  %p67_p4 = scmp.lt.s32.totalorder %s16_s10, %s16_s10 }
   0x9   :  { %p63_p3 = scmp.ne.s32.totalorder %s16_s10, %s62_s18  ;;  %p68_p5 = scmp.lt.s32.totalorder %s62_s18, %s62_s18 }
   0xb   :  { %p69_p6 = por %p68_p5, %p67_p4 }
   0xd   :  { %p70_p7 = pnand %p69_p6, %p63_p3 }
   0xf   :  { %73 = shalt.err (!%p70_p7)
}
  0x10   :  { %18 = dma.hbm_to_vmem [thread:$0]  %s144_s0, 128, %s16_s10, [#allocation3]  }
  0x11   :  { %96 = dma.done.wait [#allocation3], 128  }
  0x12   :  { %97 = vsyncadd [#allocation3], 4294967168  ;;  %v28_v0 = vlaneseq  ;;  %v24_v3 = vld [vmem:[%s145_s1] sm:$0x1]  ;;  %s101_s23 = smov [#allocation5]  }
  0x13   :  { %v25_v4 = vmax.f32 %v24_v3, 0.0  ;;  %v26_v5 = vld [vmem:[#allocation2] sm:$0xff]  ;;  %s41_s24 = sshll.u32 %s101_s23, 4  ;;  %s42_s24 = int_to_ptr.vmem [resolvable:$true] %s41_s24 }
  0x14   :  { %v29_v1 = vshrl.u32 %v28_v0, 7  ;;  %s74_s25 = scalar_lea.vmem %s42_s24, 128  ;;  %p79_p9 = scmp.lt.s32.totalorder %s42_s24, %s42_s24 }
  0x15   :  { %p75_p8 = scmp.ne.s32.totalorder %s42_s24, %s74_s25  ;;  %p80_p10 = scmp.lt.s32.totalorder %s74_s25, %s74_s25 }
  0x16   :  { %v30_v2 = vsub.s32 0, %v29_v1 }
  0x17   :  { %p81_p11 = por %p80_p10, %p79_p9 }
  0x18   :  { %v31_v6 = vrot.slane %v25_v4, %v30_v2 }
  0x19   :  { %p82_p12 = pnand %p81_p11, %p75_p8 }
  0x1a   :  { %v33_v7 = vmul.f32 %v31_v6, %v26_v5 }
  0x1c   :  { %34 = vst [vmem:[#allocation5] sm:$0xff] %v33_v7 }
  0x1d   :  { %85 = shalt.err (!%p82_p12)
}
  0x1e   :  { %s86_s27 = scalar_lea.hbm %s146_s2, 128 }
  0x1f   :  { %p87_p13 = scmp.ne.s32.totalorder %s146_s2, %s86_s27  ;;  %p90_p0 = scmp.lt.u32.totalorder %s86_s27, %s146_s2 }
  0x21   :  { %p92_p1 = pnand %p90_p0, %p87_p13 }
  0x23   :  { %95 = shalt.err (!%p92_p1)
}
  0x24   :  { %44 = dma.vmem_to_hbm [thread:$0]  %s42_s24, 128, %s146_s2, [#allocation4]  }
  0x25   :  { %98 = dma.done.wait [#allocation4], 128  }
  0x26   :  { %99 = vsyncadd [#allocation4], 4294967168 }
  0x27   :  { %48 = vsyncpa [#allocation3], 1 }
  0x28   :  { %49 = vsyncpa [#allocation4], 1 }

</bundles_post_ra>
